<compile_context>
chip_gen: v6e
topology: v6e:2x2x1
jax: 0.10.0
libtpu: 0.0.40
codegen_flags: <defaults>
</compile_context>

<pallas_src>
import jax
import jax.numpy as jnp
from jax import lax
from jax.experimental import pallas as pl
from jax.experimental.pallas import tpu as pltpu

LANES = 128
_TARGET_ORDER = ('One', 'Zero', 'NerfW', 'NerfA')
_VALID_NAMES = frozenset(_TARGET_ORDER)


def _round_down(x, m):
    return (x // m) * m


def _cdiv(a, b):
    return -(-a // b)


def _make_kernel(targets, need_w, need_a, tile_rows, sub_rows, n_valid, needs_mask):
    """L1 partial-sum kernel specialized on the enabled targets.

    Each grid step reduces a (tile_rows, 128) slab block to one (8, 128) f32
    partial per target, written to its own output block (fully parallel grid).
    """
    n_sub = tile_rows // sub_rows
    n_targets = len(targets)

    def kernel(*refs):
        refs = list(refs)
        x_ref = refs.pop(0)
        w_ref = refs.pop(0) if need_w else None
        a_ref = refs.pop(0) if need_a else None
        out_ref = refs.pop(0)

        if needs_mask:
            # Elements with global linear index >= n_valid are either zero
            # padding (ragged sizes) or garbage rows of a partial last block.
            # Non-last blocks get rem >= block size, i.e. an all-true mask.
            # (n_valid must fit in int32; loss tensors are far below 2^31.)
            rem = n_valid - pl.program_id(0) * (tile_rows * LANES)

        def body(j, accs):
            r0 = pl.multiple_of(j * sub_rows, sub_rows)
            x = x_ref[pl.ds(r0, sub_rows), :].astype(jnp.float32)
            if needs_mask:
                offs = (r0 * LANES
                        + lax.broadcasted_iota(jnp.int32, (sub_rows, LANES), 0) * LANES
                        + lax.broadcasted_iota(jnp.int32, (sub_rows, LANES), 1))
                valid = offs < rem
            new_accs = []
            for t, name in enumerate(targets):
                if name == 'One':
                    diff = jnp.abs(x - 1.0)
                elif name == 'Zero':
                    diff = jnp.abs(x)
                elif name == 'NerfW':
                    diff = jnp.abs(x - w_ref[pl.ds(r0, sub_rows), :].astype(jnp.float32))
                else:  # 'NerfA'
                    diff = jnp.abs(x - a_ref[pl.ds(r0, sub_rows), :].astype(jnp.float32))
                if needs_mask:
                    # where() (not multiply) so garbage/NaN bits are dropped.
                    diff = jnp.where(valid, diff, 0.0)
                # (sub_rows,128) -> (sub_rows//8, 8, 128) regroups whole (8,128)
                # native tiles: pure VALU vreg adds, no cross-lane XLU reduce.
                part = jnp.sum(diff.reshape(sub_rows // 8, 8, LANES), axis=0)
                new_accs.append(accs[t] + part)
            return tuple(new_accs)

        init = tuple(jnp.zeros((8, LANES), jnp.float32) for _ in range(n_targets))
        accs = lax.fori_loop(0, n_sub, body, init, unroll=True)
        for t in range(n_targets):
            out_ref[8 * t:8 * (t + 1), :] = accs[t]   # static sublane-aligned store

    return kernel


def _pure_jax_sums(outputs, nerf_weights, nerf_alpha, targets):
    """Fallback for tiny inputs (< 8 full 128-lane rows)."""
    x = outputs.reshape(-1).astype(jnp.float32)
    sums = []
    for name in targets:
        if name == 'One':
            s = jnp.sum(jnp.abs(x - 1.0))
        elif name == 'Zero':
            s = jnp.sum(jnp.abs(x))
        elif name == 'NerfW':
            s = jnp.sum(jnp.abs(x - nerf_weights.reshape(-1).astype(jnp.float32)))
        else:
            s = jnp.sum(jnp.abs(x - nerf_alpha.reshape(-1).astype(jnp.float32)))
        sums.append(s)
    return jnp.stack(sums)


def _l1_partial_sums(outputs, nerf_weights, nerf_alpha, targets, *, tile_rows=2048):
    """Single Pallas pass; returns per-target scalar sums of |outputs - target|."""
    need_w = 'NerfW' in targets
    need_a = 'NerfA' in targets
    n_targets = len(targets)
    assert n_targets > 0

    n = int(outputs.size)
    rows_slab = _cdiv(n, LANES)
    if rows_slab < 8:
        return _pure_jax_sums(outputs, nerf_weights, nerf_alpha, targets)

    pad_elems = rows_slab * LANES - n    # 0..127; nonzero only if n % 128 != 0

    def to_slab(arr):
        flat = arr.reshape(-1)                    # free (metadata only)
        if pad_elems:
            # TODO(synk): this pad is still a full-array copy; it only triggers
            # for 128-misaligned sizes. The aligned (common) path is zero-copy.
            flat = jnp.pad(flat, (0, pad_elems))
        return flat.reshape(rows_slab, LANES)     # free

    inputs = [to_slab(outputs)]
    if need_w:
        inputs.append(to_slab(nerf_weights))
    if need_a:
        inputs.append(to_slab(nerf_alpha))

    # Tile selection: lane-dense (rows,128) blocks; rows a multiple of the
    # 128-row sub-chunk when possible and never exceeding the slab.
    target = max(LANES, _round_down(int(tile_rows), LANES))
    if rows_slab >= LANES:
        tile_rows_eff = min(target, _round_down(rows_slab, LANES))
    else:
        tile_rows_eff = _round_down(rows_slab, 8)
    sub_rows = min(LANES, tile_rows_eff)
    num_blocks = _cdiv(rows_slab, tile_rows_eff)
    covered = num_blocks * tile_rows_eff * LANES
    needs_mask = covered > n             # padded zeros and/or OOB garbage present

    out_rows = 8 * n_targets
    in_spec = pl.BlockSpec((tile_rows_eff, LANES), lambda i: (i, 0))
    out_spec = pl.BlockSpec((out_rows, LANES), lambda i: (i, 0))

    # Real HBM traffic (unpadded sizes up to the <=127-element tail, only the
    # inputs actually passed, plus the tiny per-block partial writeback).
    in_bytes = sum(int(a.size) * a.dtype.itemsize for a in inputs)
    out_bytes = num_blocks * out_rows * LANES * 4
    cost = pl.CostEstimate(flops=3 * n_targets * n, transcendentals=0,
                           bytes_accessed=in_bytes + out_bytes)

    itemsize = inputs[0].dtype.itemsize
    buf_bytes = (len(inputs) * 2 * tile_rows_eff * LANES * itemsize
                 + 2 * out_rows * LANES * 4)
    # Explicit scoped-VMEM request with headroom; capped below v7x's 64 MiB/TC.
    vmem_limit = min(buf_bytes + (16 << 20), 48 << 20)

    kernel = _make_kernel(tuple(targets), need_w, need_a, tile_rows_eff,
                          sub_rows, n, needs_mask)

    out = pl.pallas_call(
        kernel,
        out_shape=jax.ShapeDtypeStruct((num_blocks * out_rows, LANES), jnp.float32),
        grid_spec=pltpu.PrefetchScalarGridSpec(
            num_scalar_prefetch=0,
            grid=(num_blocks,),
            in_specs=[in_spec] * len(inputs),
            out_specs=out_spec,
        ),
        compiler_params=pltpu.CompilerParams(
            # TODO(synk): on v7x, if xprof shows only one TensorCore active,
            # switch this axis to pltpu.CORE_PARALLEL so both TCs pull HBM.
            dimension_semantics=("parallel",),
            vmem_limit_bytes=vmem_limit),
        cost_estimate=cost,
    )(*inputs)

    # (num_blocks * 8 * n_targets, 128) lane-dense partials -> per-target scalars.
    sums = out.reshape(num_blocks, n_targets, 8, LANES).sum(axis=(0, 2, 3))
    return sums  # (n_targets,) f32


def nerf_weight_multiplication_loss(outputs, nerf_weights, nerf_alpha, *,
                                    epoch, loss_components, blend_factors,
                                    blending_start, blending_interval,
                                    tile_rows=2048):
    """Full forward pass of NeRFWeightMultiplicationLoss (static python config)."""
    for name in loss_components:
        if name not in _VALID_NAMES:
            raise ValueError(f"Unknown loss component: {name!r}")
    targets = tuple(t for t in _TARGET_ORDER if t in loss_components)
    sums = _l1_partial_sums(outputs, nerf_weights, nerf_alpha, targets,
                            tile_rows=tile_rows)
    means = sums / float(outputs.size)
    loss_by_name = {name: means[i] for i, name in enumerate(targets)}

    # TODO(synk): epoch / blend_factors are static Python config (as in the
    # PyTorch module); passing traced values here would retrace.
    factor = min(max((epoch - blending_start) / blending_interval, 0.0), 1.0)

    final_loss = None
    for i, name in enumerate(loss_components):
        bf = blend_factors[i]
        if name == 'One':
            blend = 1.0 - factor * (1.0 - bf) if bf > 0.0 else 1.0 - factor
        else:  # 'Zero', 'NerfW', 'NerfA'
            blend = factor * bf if bf > 0.0 else factor
        term = blend * loss_by_name[name]
        final_loss = term if final_loss is None else final_loss + term
    return final_loss


def _reference(outputs, nerf_weights, nerf_alpha, *, epoch, loss_components,
               blend_factors, blending_start, blending_interval):
    """Pure-JAX reference for correctness checking."""
    factor = min(max((epoch - blending_start) / blending_interval, 0.0), 1.0)
    loss_by_name = {
        'One':   jnp.mean(jnp.abs(outputs - 1.0)),
        'Zero':  jnp.mean(jnp.abs(outputs)),
        'NerfW': jnp.mean(jnp.abs(outputs - nerf_weights)),
        'NerfA': jnp.mean(jnp.abs(outputs - nerf_alpha)),
    }
    final = None
    for i, name in enumerate(loss_components):
        bf = blend_factors[i]
        if name == 'One':
            blend = 1.0 - factor * (1.0 - bf) if bf > 0.0 else 1.0 - factor
        else:
            blend = factor * bf if bf > 0.0 else factor
        term = blend * loss_by_name[name]
        final = term if final is None else final + term
    return final


if __name__ == "__main__":
    key = jax.random.PRNGKey(0)
    blending_start = 2
    blending_interval = 10
    epoch = 6

    # --- Case 1: all four components, 128-aligned (zero-copy, no-mask path) --
    loss_components = ['One', 'Zero', 'NerfW', 'NerfA']
    blend_factors = [0.5, 0.25, 1.0, 0.0]
    k1, k2, k3, k4 = jax.random.split(key, 4)
    shape = (2, 64, 128)   # (batch, rays, samples_per_ray)
    outputs = jax.random.uniform(k1, shape, dtype=jnp.float32)
    nerf_weights = jax.random.uniform(k2, shape, dtype=jnp.float32)
    nerf_alpha = jax.random.uniform(k3, shape, dtype=jnp.float32)

    loss = nerf_weight_multiplication_loss(
        outputs, nerf_weights, nerf_alpha,
        epoch=epoch, loss_components=loss_components,
        blend_factors=blend_factors, blending_start=blending_start,
        blending_interval=blending_interval)
    loss = jax.block_until_ready(loss)
    ref = jax.block_until_ready(_reference(
        outputs, nerf_weights, nerf_alpha,
        epoch=epoch, loss_components=loss_components,
        blend_factors=blend_factors, blending_start=blending_start,
        blending_interval=blending_interval))
    assert jnp.allclose(loss, ref, rtol=1e-5, atol=1e-6), (loss, ref)

    # --- Case 2: subset of components + ragged size (input specialization,
    #             minimal pad + in-kernel element masking) --------------------
    loss_components2 = ['One', 'NerfW']
    blend_factors2 = [0.0, 0.8]
    shape2 = (3, 50, 77)
    o2 = jax.random.uniform(jax.random.fold_in(k4, 0), shape2, dtype=jnp.float32)
    w2 = jax.random.uniform(jax.random.fold_in(k4, 1), shape2, dtype=jnp.float32)
    a2 = jax.random.uniform(jax.random.fold_in(k4, 2), shape2, dtype=jnp.float32)

    loss2 = jax.block_until_ready(nerf_weight_multiplication_loss(
        o2, w2, a2,
        epoch=epoch, loss_components=loss_components2,
        blend_factors=blend_factors2, blending_start=blending_start,
        blending_interval=blending_interval))
    ref2 = jax.block_until_ready(_reference(
        o2, w2, a2,
        epoch=epoch, loss_components=loss_components2,
        blend_factors=blend_factors2, blending_start=blending_start,
        blending_interval=blending_interval))
    assert jnp.allclose(loss2, ref2, rtol=1e-5, atol=1e-6), (loss2, ref2)

    # --- Case 3: bf16 inputs, aligned, multiple blocks with a partial last
    #             block (exercises the masked multi-block + bf16 path) --------
    shape3 = (4, 300, 128)
    k5, k6, k7 = jax.random.split(jax.random.fold_in(key, 7), 3)
    o3 = jax.random.uniform(k5, shape3, dtype=jnp.float32).astype(jnp.bfloat16)
    w3 = jax.random.uniform(k6, shape3, dtype=jnp.float32).astype(jnp.bfloat16)
    a3 = jax.random.uniform(k7, shape3, dtype=jnp.float32).astype(jnp.bfloat16)

    loss3 = jax.block_until_ready(nerf_weight_multiplication_loss(
        o3, w3, a3,
        epoch=epoch, loss_components=loss_components,
        blend_factors=blend_factors, blending_start=blending_start,
        blending_interval=blending_interval, tile_rows=2048))
    ref3 = jax.block_until_ready(_reference(
        o3.astype(jnp.float32), w3.astype(jnp.float32), a3.astype(jnp.float32),
        epoch=epoch, loss_components=loss_components,
        blend_factors=blend_factors, blending_start=blending_start,
        blending_interval=blending_interval))
    assert jnp.allclose(loss3, ref3, rtol=1e-4, atol=1e-5), (loss3, ref3)

    print("KERNEL_OK")
</pallas_src>

<mosaic_0001>
module attributes {stable_mosaic.version = 11 : i64} {
  func.func @kernel(%arg0: i32, %arg1: memref<128x128xf32, #tpu.memory_space<vmem>>, %arg2: memref<128x128xf32, #tpu.memory_space<vmem>>, %arg3: memref<128x128xf32, #tpu.memory_space<vmem>>, %arg4: memref<32x128xf32, #tpu.memory_space<vmem>>) attributes {dimension_semantics = [#tpu.dimension_semantics<parallel>], iteration_bounds = array<i64: 1>, scalar_prefetch = 0 : i64, scratch_operands = 0 : i64, tpu.core_type = #tpu.core_type<tc>, window_params = [{transform_indices = @transform_0, window_bounds = array<i64: 128, 128>}, {transform_indices = @transform_1, window_bounds = array<i64: 128, 128>}, {transform_indices = @transform_2, window_bounds = array<i64: 128, 128>}, {transform_indices = @transform_3, window_bounds = array<i64: 32, 128>}]} {
    %cst = arith.constant 0.000000e+00 : f32
    %0 = vector.broadcast %cst : f32 to vector<8x128xf32>
    %cst_0 = arith.constant 0.000000e+00 : f32
    %1 = vector.broadcast %cst_0 : f32 to vector<8x128xf32>
    %cst_1 = arith.constant 0.000000e+00 : f32
    %2 = vector.broadcast %cst_1 : f32 to vector<8x128xf32>
    %cst_2 = arith.constant 0.000000e+00 : f32
    %3 = vector.broadcast %cst_2 : f32 to vector<8x128xf32>
    %c0_i32 = arith.constant 0 : i32
    %c128_i32 = arith.constant 128 : i32
    %4 = arith.muli %c0_i32, %c128_i32 : i32
    %5 = tpu.assume_multiple %4, 128 : i32
    %6 = arith.index_cast %5 : i32 to index
    %c0 = arith.constant 0 : index
    %7 = vector.load %arg1[%6, %c0] : memref<128x128xf32, #tpu.memory_space<vmem>>, vector<128x128xf32>
    %cst_3 = arith.constant 1.000000e+00 : f32
    %8 = vector.broadcast %cst_3 : f32 to vector<128x128xf32>
    %9 = arith.subf %7, %8 : vector<128x128xf32>
    %10 = math.absf %9 : vector<128x128xf32>
    %11 = vector.shape_cast %10 : vector<128x128xf32> to vector<16x8x128xf32>
    %cst_4 = arith.constant dense<0.000000e+00> : vector<8x128xf32>
    %12 = vector.multi_reduction <add>, %11, %cst_4 [0] : vector<16x8x128xf32> to vector<8x128xf32>
    %13 = arith.addf %0, %12 : vector<8x128xf32>
    %14 = math.absf %7 : vector<128x128xf32>
    %15 = vector.shape_cast %14 : vector<128x128xf32> to vector<16x8x128xf32>
    %cst_5 = arith.constant dense<0.000000e+00> : vector<8x128xf32>
    %16 = vector.multi_reduction <add>, %15, %cst_5 [0] : vector<16x8x128xf32> to vector<8x128xf32>
    %17 = arith.addf %1, %16 : vector<8x128xf32>
    %18 = arith.index_cast %5 : i32 to index
    %c0_6 = arith.constant 0 : index
    %19 = vector.load %arg2[%18, %c0_6] : memref<128x128xf32, #tpu.memory_space<vmem>>, vector<128x128xf32>
    %20 = arith.subf %7, %19 : vector<128x128xf32>
    %21 = math.absf %20 : vector<128x128xf32>
    %22 = vector.shape_cast %21 : vector<128x128xf32> to vector<16x8x128xf32>
    %cst_7 = arith.constant dense<0.000000e+00> : vector<8x128xf32>
    %23 = vector.multi_reduction <add>, %22, %cst_7 [0] : vector<16x8x128xf32> to vector<8x128xf32>
    %24 = arith.addf %2, %23 : vector<8x128xf32>
    %25 = arith.index_cast %5 : i32 to index
    %c0_8 = arith.constant 0 : index
    %26 = vector.load %arg3[%25, %c0_8] : memref<128x128xf32, #tpu.memory_space<vmem>>, vector<128x128xf32>
    %27 = arith.subf %7, %26 : vector<128x128xf32>
    %28 = math.absf %27 : vector<128x128xf32>
    %29 = vector.shape_cast %28 : vector<128x128xf32> to vector<16x8x128xf32>
    %cst_9 = arith.constant dense<0.000000e+00> : vector<8x128xf32>
    %30 = vector.multi_reduction <add>, %29, %cst_9 [0] : vector<16x8x128xf32> to vector<8x128xf32>
    %31 = arith.addf %3, %30 : vector<8x128xf32>
    %c1_i32 = arith.constant 1 : i32
    %c0_10 = arith.constant 0 : index
    %c0_11 = arith.constant 0 : index
    %32 = vector.load %arg4[%c0_10, %c0_11] : memref<32x128xf32, #tpu.memory_space<vmem>>, vector<8x128xf32>
    tpu.vector_store %arg4[%c0_10, %c0_11], %13 {strides = array<i32>} : memref<32x128xf32, #tpu.memory_space<vmem>>, vector<8x128xf32>,
    %c8 = arith.constant 8 : index
    %c0_12 = arith.constant 0 : index
    %33 = vector.load %arg4[%c8, %c0_12] : memref<32x128xf32, #tpu.memory_space<vmem>>, vector<8x128xf32>
    tpu.vector_store %arg4[%c8, %c0_12], %17 {strides = array<i32>} : memref<32x128xf32, #tpu.memory_space<vmem>>, vector<8x128xf32>,
    %c16 = arith.constant 16 : index
    %c0_13 = arith.constant 0 : index
    %34 = vector.load %arg4[%c16, %c0_13] : memref<32x128xf32, #tpu.memory_space<vmem>>, vector<8x128xf32>
    tpu.vector_store %arg4[%c16, %c0_13], %24 {strides = array<i32>} : memref<32x128xf32, #tpu.memory_space<vmem>>, vector<8x128xf32>,
    %c24 = arith.constant 24 : index
    %c0_14 = arith.constant 0 : index
    %35 = vector.load %arg4[%c24, %c0_14] : memref<32x128xf32, #tpu.memory_space<vmem>>, vector<8x128xf32>
    tpu.vector_store %arg4[%c24, %c0_14], %31 {strides = array<i32>} : memref<32x128xf32, #tpu.memory_space<vmem>>, vector<8x128xf32>,
    return
  }
  func.func @transform_0(%arg0: i32) -> (i32, i32) {
    %c0_i32 = arith.constant 0 : i32
    %c0_i32_0 = arith.constant 0 : i32
    return %arg0, %c0_i32 : i32, i32
  }
  func.func @transform_1(%arg0: i32) -> (i32, i32) {
    %c0_i32 = arith.constant 0 : i32
    %c0_i32_0 = arith.constant 0 : i32
    return %arg0, %c0_i32 : i32, i32
  }
  func.func @transform_2(%arg0: i32) -> (i32, i32) {
    %c0_i32 = arith.constant 0 : i32
    %c0_i32_0 = arith.constant 0 : i32
    return %arg0, %c0_i32 : i32, i32
  }
  func.func @transform_3(%arg0: i32) -> (i32, i32) {
    %c0_i32 = arith.constant 0 : i32
    %c0_i32_0 = arith.constant 0 : i32
    return %arg0, %c0_i32 : i32, i32
  }
}

</mosaic_0001>

<bundles_post_ra>
// kernel: tpu_custom_call.1
= control target key start
LH: loop header
LB: loop body
LE: loop exit
PB: predicated region body
PF: predicated region fallthrough
CT: control target
= control target key end

     0   :  { %8 = vsyncpa [#allocation3], 0  ;;  %s556_s0 = inlined_call_operand.hbm [shape: f32[128,128], index: 0, kind: input, shape index: {}]   ;;  %s557_s1 = inlined_call_operand.hbm [shape: f32[128,128], index: 1, kind: input, shape index: {}]   ;;  %s558_s2 = inlined_call_operand.hbm [shape: f32[128,128], index: 2, kind: input, shape index: {}]   ;;  %s559_s3 = inlined_call_operand.hbm [shape: f32[32,128], index: 3, kind: output, shape index: {}]  }
   0x1   :  { %9 = vsyncpa [#allocation6], 0 }
   0x2   :  { %10 = vsyncpa [#allocation4], 0  ;;  %s410_s12 = smov [#allocation5]   ;;  %s411_s14 = smov [#allocation2]  }
   0x3   :  { %s28_s13 = sshll.u32 %s410_s12, 4  ;;  %s16_s15 = sshll.u32 %s411_s14, 4  ;;  %s29_s13 = int_to_ptr.vmem [resolvable:$true] %s28_s13  ;;  %s17_s15 = int_to_ptr.vmem [resolvable:$true] %s16_s15 }
   0x4   :  { %s332_s16 = scalar_lea.vmem %s29_s13, 2048  ;;  %p337_p1 = scmp.lt.s32.totalorder %s29_s13, %s29_s13 }
   0x5   :  { %p333_p0 = scmp.ne.s32.totalorder %s29_s13, %s332_s16  ;;  %p338_p2 = scmp.lt.s32.totalorder %s332_s16, %s332_s16 }
   0x7   :  { %p339_p3 = por %p338_p2, %p337_p1 }
   0x9   :  { %p340_p4 = pnand %p339_p3, %p333_p0 }
   0xb   :  { %343 = shalt.err (!%p340_p4)
}
   0xc   :  { %s412_s17 = smov 128   ;;  %s413_s18 = smov 8  }
   0xd   :  { %34 = dma.hbm_to_vmem [thread:$0]  %s557_s1, 2048, %s29_s13, [#allocation6], %s412_s17, %s412_s17, %s413_s18  }
   0xe   :  { %s352_s21 = scalar_lea.vmem %s17_s15, 2048  ;;  %p357_p6 = scmp.lt.s32.totalorder %s17_s15, %s17_s15 }
   0xf   :  { %p353_p5 = scmp.ne.s32.totalorder %s17_s15, %s352_s21  ;;  %p358_p7 = scmp.lt.s32.totalorder %s352_s21, %s352_s21 }
  0x11   :  { %p359_p8 = por %p358_p7, %p357_p6 }
  0x13   :  { %p360_p9 = pnand %p359_p8, %p353_p5 }
  0x15   :  { %363 = shalt.err (!%p360_p9)
}
  0x16   :  { %22 = dma.hbm_to_vmem [thread:$0]  %s556_s0, 2048, %s17_s15, [#allocation3], %s412_s17, %s412_s17, %s413_s18  }
  0x17   :  { %s414_s24 = smov [#allocation7]  }
  0x18   :  { %s40_s25 = sshll.u32 %s414_s24, 4  ;;  %s41_s25 = int_to_ptr.vmem [resolvable:$true] %s40_s25 }
  0x19   :  { %s372_s26 = scalar_lea.vmem %s41_s25, 2048  ;;  %p377_p11 = scmp.lt.s32.totalorder %s41_s25, %s41_s25 }
  0x1a   :  { %p373_p10 = scmp.ne.s32.totalorder %s41_s25, %s372_s26  ;;  %p378_p12 = scmp.lt.s32.totalorder %s372_s26, %s372_s26 }
  0x1c   :  { %p379_p13 = por %p378_p12, %p377_p11 }
  0x1e   :  { %p380_p0 = pnand %p379_p13, %p373_p10 }
  0x20   :  { %383 = shalt.err (!%p380_p0)
}
  0x21   :  { %46 = dma.hbm_to_vmem [thread:$0]  %s558_s2, 2048, %s41_s25, [#allocation6], %s412_s17, %s412_s17, %s413_s18  }
  0x22   :  { %404 = dma.done.wait [#allocation3], 2048  }
  0x23   :  { %405 = vsyncadd [#allocation3], 4294965248 }
  0x24   :  { %406 = dma.done.wait [#allocation6], 4096  }
  0x25   :  { %407 = vsyncadd [#allocation6], 4294963200  ;;  %v454_v0 = vld [vmem:[#allocation2] sm:$0xff]  ;;  %v456_v1 = vld [vmem:[#allocation2 + $0x8] sm:$0xff]  ;;  %s415_s0 = smov [#allocation8]  }
  0x26   :  { %v458_v2 = vld [vmem:[#allocation2 + $0x10] sm:$0xff]  ;;  %v460_v3 = vld [vmem:[#allocation2 + $0x18] sm:$0xff]  ;;  %v302_v4 = vadd.f32 -1.0, %v454_v0  ;;  %v303_v5 = vadd.f32 -1.0, %v456_v1  ;;  %v465_v7 = vld [vmem:[#allocation2 + $0x20] sm:$0xff]  ;;  %s289_s2 = sshll.u32 %s415_s0, 4  ;;  %s290_s2 = int_to_ptr.vmem [resolvable:$true] %s289_s2 }
  0x27   :  { %v304_v6 = vadd.f32 -1.0, %v458_v2  ;;  %v305_v8 = vadd.f32 -1.0, %v460_v3  ;;  %v468_v9 = vld [vmem:[#allocation2 + $0x28] sm:$0xff]  ;;  %v306_v11 = vadd.f32 -1.0, %v465_v7  ;;  %v471_v14 = vld [vmem:[#allocation2 + $0x30] sm:$0xff]  ;;  %v474_v18 = vld [vmem:[#allocation2 + $0x38] sm:$0xff]  ;;  %p389_p2 = scmp.lt.s32.totalorder %s290_s2, %s290_s2 }
  0x28   :  { %v88_v10 = vand.u32 2147483647, %v302_v4  ;;  %v89_v12 = vand.u32 2147483647, %v303_v5  ;;  %v307_v15 = vadd.f32 -1.0, %v468_v9  ;;  %v308_v19 = vadd.f32 -1.0, %v471_v14 }
  0x29   :  { %v90_v13 = vand.u32 2147483647, %v304_v6  ;;  %v91_v16 = vand.u32 2147483647, %v305_v8  ;;  %v92_v20 = vand.u32 2147483647, %v306_v11 }
  0x2a   :  { %v104_v17 = vadd.f32 %v89_v12, %v88_v10  ;;  %v477_v22 = vld [vmem:[#allocation2 + $0x40] sm:$0xff]  ;;  %v120_v23 = vand.u32 2147483647, %v454_v0  ;;  %v121_v24 = vand.u32 2147483647, %v456_v1  ;;  %v309_v25 = vadd.f32 -1.0, %v474_v18 }
  0x2b   :  { %v93_v26 = vand.u32 2147483647, %v307_v15  ;;  %v122_v28 = vand.u32 2147483647, %v458_v2  ;;  %v483_v29 = vld [vmem:[#allocation2 + $0x48] sm:$0xff]  ;;  %v486_v32 = vld [vmem:[#allocation2 + $0x50] sm:$0xff] }
  0x2c   :  { %v105_v21 = vadd.f32 %v104_v17, %v90_v13  ;;  %v123_v30 = vand.u32 2147483647, %v460_v3  ;;  %v136_v31 = vadd.f32 %v121_v24, %v120_v23  ;;  %v310_v33 = vadd.f32 -1.0, %v477_v22  ;;  %v489_v36 = vld [vmem:[#allocation2 + $0x58] sm:$0xff]  ;;  %v152_v42 = vld [vmem:[#allocation5] sm:$0xff]  ;;  %v153_v43 = vld [vmem:[#allocation5 + $0x8] sm:$0xff] }
  0x2d   :  { %v94_v34 = vand.u32 2147483647, %v308_v19  ;;  %v124_v37 = vand.u32 2147483647, %v465_v7  ;;  %v311_v39 = vadd.f32 -1.0, %v483_v29  ;;  %v493_v44 = vld [vmem:[#allocation2 + $0x60] sm:$0xff]  ;;  %v168_v56 = vsub.f32 %v454_v0, %v152_v42 }
  0x2e   :  { %v106_v27 = vadd.f32 %v105_v21, %v91_v16  ;;  %v137_v38 = vadd.f32 %v136_v31, %v122_v28  ;;  %v95_v40 = vand.u32 2147483647, %v309_v25  ;;  %v495_v45 = vld [vmem:[#allocation2 + $0x68] sm:$0xff]  ;;  %v312_v46 = vadd.f32 -1.0, %v486_v32  ;;  %v154_v52 = vld [vmem:[#allocation5 + $0x10] sm:$0xff]  ;;  %v155_v62 = vld [vmem:[#allocation5 + $0x18] sm:$0xff] }
  0x2f   :  { %v125_v47 = vand.u32 2147483647, %v468_v9  ;;  %v313_v49 = vadd.f32 -1.0, %v489_v36  ;;  %v96_v50 = vand.u32 2147483647, %v310_v33  ;;  %v500_v53 = vld [vmem:[#allocation2 + $0x70] sm:$0xff]  ;;  %v169_v57 = vsub.f32 %v456_v1, %v153_v43 }
  0x30   :  { %v107_v35 = vadd.f32 %v106_v27, %v92_v20  ;;  %v138_v48 = vadd.f32 %v137_v38, %v123_v30  ;;  %v126_v54 = vand.u32 2147483647, %v471_v14  ;;  %v314_v58 = vadd.f32 -1.0, %v493_v44  ;;  %v507_v63 = vld [vmem:[#allocation2 + $0x78] sm:$0xff]  ;;  %v156_v15 = vld [vmem:[#allocation5 + $0x20] sm:$0xff]  ;;  %v217_v43 = vld [vmem:[#allocation7 + $0x8] sm:$0xff] }
  0x31   :  { %v315_v59 = vadd.f32 -1.0, %v495_v45  ;;  %v97_v60 = vand.u32 2147483647, %v311_v39  ;;  %v98_v4 = vand.u32 2147483647, %v312_v46  ;;  %v170_v8 = vsub.f32 %v458_v2, %v154_v52  ;;  %v216_v42 = vld [vmem:[#allocation7] sm:$0xff] }
  0x32   :  { %v108_v41 = vadd.f32 %v107_v35, %v93_v26  ;;  %v139_v55 = vadd.f32 %v138_v48, %v124_v37  ;;  %v127_v5 = vand.u32 2147483647, %v474_v18  ;;  %v316_v10 = vadd.f32 -1.0, %v500_v53  ;;  %v157_v26 = vld [vmem:[#allocation5 + $0x28] sm:$0xff]  ;;  %v158_v37 = vld [vmem:[#allocation5 + $0x30] sm:$0xff]  ;;  %s384_s28 = scalar_lea.vmem %s290_s2, 512 }
  0x33   :  { %v99_v11 = vand.u32 2147483647, %v313_v49  ;;  %v128_v13 = vand.u32 2147483647, %v477_v22  ;;  %v171_v17 = vsub.f32 %v460_v3, %v155_v62  ;;  %v184_v19 = vand.u32 2147483647, %v168_v56  ;;  %p385_p1 = scmp.ne.s32.totalorder %s290_s2, %s384_s28  ;;  %p390_p3 = scmp.lt.s32.totalorder %s384_s28, %s384_s28 }
  0x34   :  { %v109_v51 = vadd.f32 %v108_v41, %v94_v34  ;;  %v140_v6 = vadd.f32 %v139_v55, %v125_v47  ;;  %v185_v20 = vand.u32 2147483647, %v169_v57  ;;  %v317_v21 = vadd.f32 -1.0, %v507_v63  ;;  %v159_v49 = vld [vmem:[#allocation5 + $0x38] sm:$0xff]  ;;  %v218_v55 = vld [vmem:[#allocation7 + $0x10] sm:$0xff] }
  0x35   :  { %v100_v23 = vand.u32 2147483647, %v314_v58  ;;  %v101_v24 = vand.u32 2147483647, %v315_v59  ;;  %v129_v27 = vand.u32 2147483647, %v483_v29  ;;  %v172_v30 = vsub.f32 %v465_v7, %v156_v15  ;;  %p391_p4 = por %p390_p3, %p389_p2 }
  0x36   :  { %v110_v61 = vadd.f32 %v109_v51, %v95_v40  ;;  %v141_v16 = vadd.f32 %v140_v6, %v126_v54  ;;  %v186_v31 = vand.u32 2147483647, %v170_v8  ;;  %v102_v33 = vand.u32 2147483647, %v316_v10  ;;  %v160_v58 = vld [vmem:[#allocation5 + $0x40] sm:$0xff]  ;;  %v219_v6 = vld [vmem:[#allocation7 + $0x18] sm:$0xff] }
  0x37   :  { %v130_v35 = vand.u32 2147483647, %v486_v32  ;;  %v173_v39 = vsub.f32 %v468_v9, %v157_v26  ;;  %v187_v40 = vand.u32 2147483647, %v171_v17  ;;  %v200_v41 = vadd.f32 %v185_v20, %v184_v19  ;;  %v162_v20 = vld [vmem:[#allocation5 + $0x50] sm:$0xff]  ;;  %p392_p5 = pnand %p391_p4, %p385_p1 }
  0x38   :  { %v111_v12 = vadd.f32 %v110_v61, %v96_v50  ;;  %v142_v28 = vadd.f32 %v141_v16, %v127_v5  ;;  %v103_v46 = vand.u32 2147483647, %v317_v21  ;;  %v131_v48 = vand.u32 2147483647, %v489_v36 }
  0x39   :  { %v174_v51 = vsub.f32 %v471_v14, %v158_v37  ;;  %v188_v52 = vand.u32 2147483647, %v172_v30  ;;  %v201_v54 = vadd.f32 %v200_v41, %v186_v31  ;;  %v132_v57 = vand.u32 2147483647, %v493_v44  ;;  %v221_v30 = vld [vmem:[#allocation7 + $0x28] sm:$0xff]  ;;  %v164_v41 = vld [vmem:[#allocation5 + $0x60] sm:$0xff] }
  0x3a   :  { %v112_v25 = vadd.f32 %v111_v12, %v97_v60  ;;  %v143_v38 = vadd.f32 %v142_v28, %v128_v13  ;;  %v232_v59 = vsub.f32 %v454_v0, %v216_v42  ;;  %v233_v60 = vsub.f32 %v456_v1, %v217_v43  ;;  %v161_v12 = vld [vmem:[#allocation5 + $0x48] sm:$0xff]  ;;  %v220_v1 = vld [vmem:[#allocation7 + $0x20] sm:$0xff] }
  0x3b   :  { %v175_v62 = vsub.f32 %v474_v18, %v159_v49  ;;  %v202_v5 = vadd.f32 %v201_v54, %v187_v40  ;;  %v133_v10 = vand.u32 2147483647, %v495_v45  ;;  %v234_v13 = vsub.f32 %v458_v2, %v218_v55  ;;  %v222_v40 = vld [vmem:[#allocation7 + $0x30] sm:$0xff] }
  0x3c   :  { %v113_v34 = vadd.f32 %v112_v25, %v98_v4  ;;  %v144_v50 = vadd.f32 %v143_v38, %v129_v27  ;;  %v189_v4 = vand.u32 2147483647, %v173_v39  ;;  %v176_v16 = vsub.f32 %v477_v22, %v160_v58 }
  0x3d   :  { %v190_v0 = vand.u32 2147483647, %v174_v51  ;;  %v203_v17 = vadd.f32 %v202_v5, %v188_v52  ;;  %v235_v21 = vsub.f32 %v460_v3, %v219_v6  ;;  %v249_v25 = vand.u32 2147483647, %v233_v60  ;;  %v223_v51 = vld [vmem:[#allocation7 + $0x38] sm:$0xff]  ;;  %v224_v60 = vld [vmem:[#allocation7 + $0x40] sm:$0xff] }
  0x3e   :  { %v114_v47 = vadd.f32 %v113_v34, %v99_v11  ;;  %v145_v61 = vadd.f32 %v144_v50, %v130_v35  ;;  %v134_v11 = vand.u32 2147483647, %v500_v53  ;;  %v177_v26 = vsub.f32 %v483_v29, %v161_v12  ;;  %v163_v34 = vld [vmem:[#allocation5 + $0x58] sm:$0xff] }
  0x3f   :  { %v191_v27 = vand.u32 2147483647, %v175_v62  ;;  %v204_v28 = vadd.f32 %v203_v17, %v189_v4  ;;  %v135_v2 = vand.u32 2147483647, %v507_v63  ;;  %v236_v35 = vsub.f32 %v465_v7, %v220_v1  ;;  %v165_v7 = vld [vmem:[#allocation5 + $0x68] sm:$0xff]  ;;  %v226_v17 = vld [vmem:[#allocation7 + $0x50] sm:$0xff] }
  0x40   :  { %v115_v56 = vadd.f32 %v114_v47, %v100_v23  ;;  %v146_v15 = vadd.f32 %v145_v61, %v131_v48  ;;  %v248_v23 = vand.u32 2147483647, %v232_v59  ;;  %v250_v37 = vand.u32 2147483647, %v234_v13 }
  0x41   :  { %v192_v39 = vand.u32 2147483647, %v176_v16  ;;  %v205_v3 = vadd.f32 %v204_v28, %v190_v0  ;;  %v237_v42 = vsub.f32 %v468_v9, %v221_v30  ;;  %v251_v43 = vand.u32 2147483647, %v235_v21  ;;  %v166_v9 = vld [vmem:[#allocation5 + $0x70] sm:$0xff]  ;;  %v228_v30 = vld [vmem:[#allocation7 + $0x60] sm:$0xff] }
  0x42   :  { %v116_v8 = vadd.f32 %v115_v56, %v101_v24  ;;  %v147_v24 = vadd.f32 %v146_v15, %v132_v57  ;;  %v264_v47 = vadd.f32 %v249_v25, %v248_v23  ;;  %v193_v49 = vand.u32 2147483647, %v177_v26  ;;  %v227_v25 = vld [vmem:[#allocation7 + $0x58] sm:$0xff] }
  0x43   :  { %v206_v50 = vadd.f32 %v205_v3, %v191_v27  ;;  %v238_v52 = vsub.f32 %v471_v14, %v222_v40  ;;  %v252_v54 = vand.u32 2147483647, %v236_v35  ;;  %v180_v57 = vsub.f32 %v493_v44, %v164_v41  ;;  %v167_v14 = vld [vmem:[#allocation5 + $0x78] sm:$0xff]  ;;  %v230_v40 = vld [vmem:[#allocation7 + $0x70] sm:$0xff] }
  0x44   :  { %v117_v19 = vadd.f32 %v116_v8, %v102_v33  ;;  %v148_v38 = vadd.f32 %v147_v24, %v133_v10  ;;  %v178_v33 = vsub.f32 %v486_v32, %v162_v20  ;;  %v265_v55 = vadd.f32 %v264_v47, %v250_v37  ;;  %v225_v10 = vld [vmem:[#allocation7 + $0x48] sm:$0xff]  ;;  %v231_v47 = vld [vmem:[#allocation7 + $0x78] sm:$0xff] }
  0x45   :  { %v207_v59 = vadd.f32 %v206_v50, %v192_v39  ;;  %v239_v61 = vsub.f32 %v474_v18, %v223_v51  ;;  %v253_v62 = vand.u32 2147483647, %v237_v42  ;;  %v181_v5 = vsub.f32 %v495_v45, %v165_v7  ;;  %v229_v37 = vld [vmem:[#allocation7 + $0x68] sm:$0xff] }
  0x46   :  { %v118_v31 = vadd.f32 %v117_v19, %v103_v46  ;;  %v149_v48 = vadd.f32 %v148_v38, %v134_v11  ;;  %v179_v46 = vsub.f32 %v489_v36, %v163_v34  ;;  %v194_v58 = vand.u32 2147483647, %v178_v33 }
  0x47   :  { %v266_v4 = vadd.f32 %v265_v55, %v251_v43  ;;  %v208_v8 = vadd.f32 %v207_v59, %v193_v49  ;;  %v240_v11 = vsub.f32 %v477_v22, %v224_v60  ;;  %v254_v12 = vand.u32 2147483647, %v238_v52 }
  0x48   :  { %280 = vst [vmem:[#allocation8] sm:$0xff] %v118_v31  ;;  %v150_v56 = vadd.f32 %v149_v48, %v135_v2  ;;  %v195_v6 = vand.u32 2147483647, %v179_v46  ;;  %v182_v15 = vsub.f32 %v500_v53, %v166_v9  ;;  %v196_v16 = vand.u32 2147483647, %v180_v57 }
  0x49   :  { %v267_v13 = vadd.f32 %v266_v4, %v252_v54  ;;  %v209_v0 = vadd.f32 %v208_v8, %v194_v58  ;;  %v241_v18 = vsub.f32 %v483_v29, %v225_v10  ;;  %v255_v1 = vand.u32 2147483647, %v239_v61 }
  0x4a   :  { %281 = vst [vmem:[#allocation8 + $0x8] sm:$0xff] %v150_v56  ;;  %v183_v20 = vsub.f32 %v507_v63, %v167_v14  ;;  %v197_v21 = vand.u32 2147483647, %v181_v5  ;;  %v242_v24 = vsub.f32 %v486_v32, %v226_v17  ;;  %v256_v26 = vand.u32 2147483647, %v240_v11 }
  0x4b   :  { %v268_v19 = vadd.f32 %v267_v13, %v253_v62  ;;  %v210_v23 = vadd.f32 %v209_v0, %v195_v6  ;;  %v198_v27 = vand.u32 2147483647, %v182_v15  ;;  %v243_v31 = vsub.f32 %v489_v36, %v227_v25 }
  0x4c   :  { %v257_v2 = vand.u32 2147483647, %v241_v18  ;;  %v199_v35 = vand.u32 2147483647, %v183_v20  ;;  %v244_v38 = vsub.f32 %v493_v44, %v228_v30  ;;  %v258_v33 = vand.u32 2147483647, %v242_v24 }
  0x4d   :  { %v269_v22 = vadd.f32 %v268_v19, %v254_v12  ;;  %v211_v28 = vadd.f32 %v210_v23, %v196_v16  ;;  %v245_v32 = vsub.f32 %v495_v45, %v229_v37  ;;  %v259_v41 = vand.u32 2147483647, %v243_v31 }
  0x4e   :  { %v246_v48 = vsub.f32 %v500_v53, %v230_v40  ;;  %v260_v36 = vand.u32 2147483647, %v244_v38  ;;  %v247_v49 = vsub.f32 %v507_v63, %v231_v47 }
  0x4f   :  { %v270_v34 = vadd.f32 %v269_v22, %v255_v1  ;;  %v212_v29 = vadd.f32 %v211_v28, %v197_v21  ;;  %v261_v50 = vand.u32 2147483647, %v245_v32 }
  0x50   :  { %v262_v44 = vand.u32 2147483647, %v246_v48  ;;  %v263_v52 = vand.u32 2147483647, %v247_v49 }
  0x51   :  { %v271_v39 = vadd.f32 %v270_v34, %v256_v26  ;;  %v213_v3 = vadd.f32 %v212_v29, %v198_v27 }
  0x53   :  { %v272_v42 = vadd.f32 %v271_v39, %v257_v2  ;;  %v214_v43 = vadd.f32 %v213_v3, %v199_v35 }
  0x55   :  { %v273_v46 = vadd.f32 %v272_v42, %v258_v33  ;;  %282 = vst [vmem:[#allocation8 + $0x10] sm:$0xff] %v214_v43 }
  0x57   :  { %v274_v51 = vadd.f32 %v273_v46, %v259_v41 }
  0x59   :  { %v275_v7 = vadd.f32 %v274_v51, %v260_v36 }
  0x5b   :  { %v276_v54 = vadd.f32 %v275_v7, %v261_v50 }
  0x5d   :  { %v277_v45 = vadd.f32 %v276_v54, %v262_v44 }
  0x5f   :  { %v278_v55 = vadd.f32 %v277_v45, %v263_v52 }
  0x61   :  { %283 = vst [vmem:[#allocation8 + $0x18] sm:$0xff] %v278_v55 }
  0x62   :  { %395 = shalt.err (!%p392_p5)
}
  0x63   :  { %295 = dma.vmem_to_hbm [thread:$0]  %s290_s2, 512, %s559_s3, [#allocation4], %s412_s17, %s412_s17, %s413_s18  }
  0x64   :  { %408 = dma.done.wait [#allocation4], 512  }
  0x65   :  { %409 = vsyncadd [#allocation4], 4294966784 }
  0x66   :  { %299 = vsyncpa [#allocation3], 1 }
  0x67   :  { %300 = vsyncpa [#allocation6], 1 }
  0x68   :  { %301 = vsyncpa [#allocation4], 1 }

</bundles_post_ra>
